<compile_context>
chip_gen: v5e
topology: v5e:2x2
jax: 0.10.0
libtpu: 0.0.40
codegen_flags: <defaults>
</compile_context>

<pallas_src>
import jax
import jax.numpy as jnp
from jax import lax
from jax.experimental import pallas as pl
from jax.experimental.pallas import tpu as pltpu


def _round_up(x, m):
    return ((x + m - 1) // m) * m


def _vmem_limit_bytes():
    """Generation-aware scoped-VMEM budget: ~60% of physical VMEM
    (64 MiB on v7x, 128 MiB on v5e/v6e), capped at 100 MiB."""
    try:
        cap = int(pltpu.get_tpu_info().vmem_capacity_bytes)
    except Exception:
        cap = 64 * 1024 * 1024
    return int(min(cap * 0.6, 100 * 1024 * 1024))


# ---------------------------------------------------------------------------
# Kernel 1: per-view attention-score partials, node-parallel grid.
# ---------------------------------------------------------------------------
def _make_score_kernel(n_total, tile_n, needs_mask):
    def kernel(x_ref, w_ref, b_ref, q_ref, part_ref):
        # x_ref: (M, tile_n, F_in)   w_ref: (F_in, Fp)
        # b_ref/q_ref: (1, Fp)       part_ref: (1, M, Fp) f32
        num_views = x_ref.shape[0]
        w = w_ref[...]
        bvec = b_ref[...]
        qvec = q_ref[...]
        if needs_mask:  # partial last node tile: zero rows with index >= n_total
            valid = n_total - pl.program_id(0) * tile_n
            row = lax.broadcasted_iota(jnp.int32, (tile_n, 1), 0)
            mask = row < valid
        for m in range(num_views):  # M is tiny & static -> fully unrolled
            h = jnp.dot(x_ref[m], w, preferred_element_type=jnp.float32) + bvec
            scored = jnp.tanh(h) * qvec                     # (tile_n, Fp) f32
            if needs_mask:
                scored = jnp.where(mask, scored, 0.0)
            # Node-axis partial; the tiny Fp reduction, /N and softmax are glue.
            part_ref[0, pl.ds(m, 1)] = jnp.sum(scored, axis=0, keepdims=True)
    return kernel


# ---------------------------------------------------------------------------
# Kernel 2: lane-dense weighted combination of the M views (write-once).
# ---------------------------------------------------------------------------
def _combine_kernel(coeff_ref, x_ref, z_ref):
    # coeff_ref: (M,) f32 in SMEM   x_ref: (M, TILE_F)   z_ref: (1, TILE_F)
    num_views = x_ref.shape[0]
    acc = jnp.zeros(z_ref.shape, jnp.float32)
    for m in range(num_views):  # unrolled; Z tile is written exactly once
        acc = acc + coeff_ref[m] * x_ref[pl.ds(m, 1), :].astype(jnp.float32)
    z_ref[...] = acc.astype(z_ref.dtype)


def semantic_attention(node_attentions, W, b, q, aloha, link_prediction_layer,
                       *, tile_n=4096, tile_flat=256 * 1024):
    M, N, F_in = node_attentions.shape
    F_out = W.shape[1]
    x = node_attentions
    vmem_limit = _vmem_limit_bytes()

    # Lane-dense padding of the projection (Fp = next multiple of 128; padded
    # W columns / q rows are zero so tanh(0)*0 == 0 exactly -> score unchanged).
    Fp = _round_up(max(F_out, 1), 128)
    pad = Fp - F_out
    # The matmul runs in the data's own floating dtype: a bf16 input halves
    # kernel 1's dominant HBM read without any extra cast pass in the wrapper.
    mm_dtype = x.dtype if jnp.issubdtype(x.dtype, jnp.floating) else jnp.float32
    Wp = jnp.pad(W.astype(jnp.float32), ((0, 0), (0, pad))).astype(mm_dtype)
    bp = jnp.pad(b.astype(jnp.float32).reshape(1, F_out), ((0, 0), (0, pad)))
    qp = jnp.pad(q.astype(jnp.float32).reshape(1, F_out), ((0, 0), (0, pad)))
    x_mm = x if x.dtype == mm_dtype else x.astype(mm_dtype)

    # --- Kernel 1: per-view scores, node axis parallel, f32 accumulation ----
    itemsize = jnp.dtype(mm_dtype).itemsize
    f_in_lanes = _round_up(F_in, 128)            # VMEM lane padding of the X tile
    x_budget = vmem_limit // 2                   # headroom for W/b/q/out blocks
    tn_cap = max(8, x_budget // (2 * M * f_in_lanes * itemsize))
    tn = min(tile_n, tn_cap)
    if tn >= N:
        tn = N                                   # single full-extent tile
    else:
        tn = max(8, (tn // 8) * 8)               # sublane-aligned
    num_tiles = pl.cdiv(N, tn)
    needs_mask = (N % tn) != 0

    partials = pl.pallas_call(
        _make_score_kernel(N, tn, needs_mask),
        out_shape=jax.ShapeDtypeStruct((num_tiles, M, Fp), jnp.float32),
        grid=(num_tiles,),
        in_specs=[
            # NOTE: add pipeline_mode=pl.Buffered(3) here only if xprof still
            # shows exposed DMA after the larger tiles (mainly relevant on v5e).
            pl.BlockSpec((M, tn, F_in), lambda n: (0, n, 0)),
            pl.BlockSpec((F_in, Fp), lambda n: (0, 0)),
            pl.BlockSpec((1, Fp), lambda n: (0, 0)),
            pl.BlockSpec((1, Fp), lambda n: (0, 0)),
        ],
        out_specs=pl.BlockSpec((1, M, Fp), lambda n: (n, 0, 0)),
        compiler_params=pltpu.CompilerParams(
            dimension_semantics=("parallel",),
            vmem_limit_bytes=vmem_limit),
    )(x_mm, Wp, bp, qp)

    # --- Glue: tiny length-M score vector -> softmax -> coefficients --------
    w_meta = partials.sum(axis=(0, 2)) / N                          # (M,)
    beta = jax.nn.softmax(w_meta)
    idx = jnp.arange(M)
    coeffs = jnp.where(
        idx == link_prediction_layer,
        jnp.float32(aloha),
        jnp.float32(1.0 - aloha) * beta,
    ).astype(jnp.float32)                                           # (M,)

    # --- Kernel 2: flatten to (M, N*F_in) so the combine is lane-dense ------
    NF = N * F_in
    # VMEM per lane: 2 buffers x (pad8(M) input + pad8(1) output) sublanes.
    per_lane = 2 * (_round_up(M, 8) + 8) * jnp.dtype(x.dtype).itemsize
    tf_cap = max(128, int(vmem_limit * 0.6) // per_lane)
    tf_ = min(tile_flat, tf_cap)
    if tf_ >= NF:
        tf_ = NF                                 # single full-extent tile
    else:
        tf_ = max(128, (tf_ // 128) * 128)       # lane-aligned; last tile may be partial
    x_flat = x.reshape(M, NF)

    z_flat = pl.pallas_call(
        _combine_kernel,
        out_shape=jax.ShapeDtypeStruct((1, NF), x.dtype),
        grid=(pl.cdiv(NF, tf_),),
        in_specs=[
            pl.BlockSpec(memory_space=pltpu.MemorySpace.SMEM),
            pl.BlockSpec((M, tf_), lambda t: (0, t)),
        ],
        out_specs=pl.BlockSpec((1, tf_), lambda t: (0, t)),
        compiler_params=pltpu.CompilerParams(
            dimension_semantics=("parallel",),
            vmem_limit_bytes=vmem_limit),
    )(coeffs, x_flat)

    return z_flat.reshape(N, F_in)


# ---------------------------------------------------------------------------
# Pure-JAX reference (mirrors the PyTorch forward).
# ---------------------------------------------------------------------------
def semantic_attention_reference(x, W, b, q, aloha, layer):
    xf = x.astype(jnp.float32)
    trans = jnp.tanh(xf @ W + b)                                    # (M, N, F_out)
    w_meta = (trans @ q)[..., 0]                                    # (M, N)
    w_meta = w_meta.sum(axis=1) / w_meta.shape[1]                   # (M,)
    beta = jax.nn.softmax(w_meta)
    idx = jnp.arange(x.shape[0])
    coeffs = jnp.where(idx == layer, aloha, (1.0 - aloha) * beta)
    return jnp.einsum("m,mnf->nf", coeffs, xf).astype(x.dtype)


def _xavier(key, shape, fan_in, fan_out, gain=1.414):
    bound = gain * (6.0 / (fan_in + fan_out)) ** 0.5
    return jax.random.uniform(key, shape, jnp.float32, -bound, bound)


def _run_case(key, M, N, F_in, F_out, aloha, layer, **kw):
    kW, kb, kq, kx = jax.random.split(key, 4)
    # torch xavier_uniform_ fan convention for 2-D: fan_in=size(1), fan_out=size(0)
    W = _xavier(kW, (F_in, F_out), F_out, F_in)
    b = _xavier(kb, (1, F_out), F_out, 1)
    q = _xavier(kq, (F_out, 1), 1, F_out)
    x = jax.random.normal(kx, (M, N, F_in), dtype=jnp.float32)

    Z = jax.block_until_ready(semantic_attention(x, W, b, q, aloha, layer, **kw))
    Z_ref = semantic_attention_reference(x, W, b, q, aloha, layer)
    if not jnp.allclose(Z, Z_ref, rtol=1e-4, atol=1e-4):
        raise AssertionError(
            f"mismatch (M={M},N={N},F_in={F_in},F_out={F_out}): "
            f"max abs err {jnp.max(jnp.abs(Z - Z_ref))}")


if __name__ == "__main__":
    key = jax.random.PRNGKey(0)
    k1, k2, k3 = jax.random.split(key, 3)

    # Small shapes consistent with the module.
    _run_case(k1, M=4, N=16, F_in=32, F_out=32, aloha=0.5, layer=1)

    # Non-divisible N: exercises the masked partial node tile (score grid (4,))
    # and a partial trailing tile in the lane-dense combine (grid (8,)).
    _run_case(k2, M=3, N=1000, F_in=64, F_out=48, aloha=0.3, layer=2,
              tile_n=256, tile_flat=8192)

    # Tiny N that is not a multiple of 8 (single full-extent tile on both kernels).
    _run_case(k3, M=4, N=10, F_in=32, F_out=8, aloha=0.7, layer=0)

    print("KERNEL_OK")
</pallas_src>

<mosaic_0001>
module attributes {stable_mosaic.version = 11 : i64} {
  func.func @kernel(%arg0: i32, %arg1: memref<4x16x32xf32, #tpu.memory_space<vmem>>, %arg2: memref<32x128xf32, #tpu.memory_space<vmem>>, %arg3: memref<1x128xf32, #tpu.memory_space<vmem>>, %arg4: memref<1x128xf32, #tpu.memory_space<vmem>>, %arg5: memref<1x4x128xf32, #tpu.memory_space<vmem>>) attributes {dimension_semantics = [#tpu.dimension_semantics<parallel>], iteration_bounds = array<i64: 1>, scalar_prefetch = 0 : i64, scratch_operands = 0 : i64, tpu.core_type = #tpu.core_type<tc>, window_params = [{transform_indices = @transform_0, window_bounds = array<i64: 4, 16, 32>}, {pipeline_mode = #tpu.pipeline_mode<synchronous>, transform_indices = @transform_1, window_bounds = array<i64: 32, 128>}, {pipeline_mode = #tpu.pipeline_mode<synchronous>, transform_indices = @transform_2, window_bounds = array<i64: 1, 128>}, {pipeline_mode = #tpu.pipeline_mode<synchronous>, transform_indices = @transform_3, window_bounds = array<i64: 1, 128>}, {transform_indices = @transform_4, window_bounds = array<i64: 1, 4, 128>}]} {
    %c0 = arith.constant 0 : index
    %c0_0 = arith.constant 0 : index
    %0 = vector.load %arg2[%c0, %c0_0] : memref<32x128xf32, #tpu.memory_space<vmem>>, vector<32x128xf32>
    %c0_1 = arith.constant 0 : index
    %c0_2 = arith.constant 0 : index
    %1 = vector.load %arg3[%c0_1, %c0_2] : memref<1x128xf32, #tpu.memory_space<vmem>>, vector<1x128xf32>
    %c0_3 = arith.constant 0 : index
    %c0_4 = arith.constant 0 : index
    %2 = vector.load %arg4[%c0_3, %c0_4] : memref<1x128xf32, #tpu.memory_space<vmem>>, vector<1x128xf32>
    %c0_5 = arith.constant 0 : index
    %c0_6 = arith.constant 0 : index
    %c0_7 = arith.constant 0 : index
    %3 = vector.load %arg1[%c0_5, %c0_6, %c0_7] : memref<4x16x32xf32, #tpu.memory_space<vmem>>, vector<1x16x32xf32>
    %4 = vector.shape_cast %3 : vector<1x16x32xf32> to vector<16x32xf32>
    %cst = arith.constant dense<0.000000e+00> : vector<16x128xf32>
    %5 = tpu.matmul %4, %0, %cst {dimension_numbers = #tpu.dot_dimension_numbers<[1], [0], [0], [1], [0, 0, 1, 1], [], []>} : vector<16x32xf32>, vector<32x128xf32>, vector<16x128xf32> -> vector<16x128xf32>
    %6 = vector.broadcast %1 : vector<1x128xf32> to vector<16x128xf32>
    %7 = arith.addf %5, %6 : vector<16x128xf32>
    %8 = math.tanh %7 : vector<16x128xf32>
    %9 = vector.broadcast %2 : vector<1x128xf32> to vector<16x128xf32>
    %10 = arith.mulf %8, %9 : vector<16x128xf32>
    %cst_8 = arith.constant dense<0.000000e+00> : vector<128xf32>
    %11 = vector.multi_reduction <add>, %10, %cst_8 [0] : vector<16x128xf32> to vector<128xf32>
    %12 = vector.shape_cast %11 : vector<128xf32> to vector<1x128xf32>
    %c0_9 = arith.constant 0 : index
    %c0_10 = arith.constant 0 : index
    %c0_11 = arith.constant 0 : index
    %13 = vector.load %arg5[%c0_9, %c0_10, %c0_11] : memref<1x4x128xf32, #tpu.memory_space<vmem>>, vector<1x1x128xf32>
    %14 = vector.shape_cast %13 : vector<1x1x128xf32> to vector<1x128xf32>
    %15 = vector.shape_cast %12 : vector<1x128xf32> to vector<1x1x128xf32>
    tpu.vector_store %arg5[%c0_9, %c0_10, %c0_11], %15 {strides = array<i32>} : memref<1x4x128xf32, #tpu.memory_space<vmem>>, vector<1x1x128xf32>,
    %c1 = arith.constant 1 : index
    %c0_12 = arith.constant 0 : index
    %c0_13 = arith.constant 0 : index
    %16 = vector.load %arg1[%c1, %c0_12, %c0_13] : memref<4x16x32xf32, #tpu.memory_space<vmem>>, vector<1x16x32xf32>
    %17 = vector.shape_cast %16 : vector<1x16x32xf32> to vector<16x32xf32>
    %cst_14 = arith.constant dense<0.000000e+00> : vector<16x128xf32>
    %18 = tpu.matmul %17, %0, %cst_14 {dimension_numbers = #tpu.dot_dimension_numbers<[1], [0], [0], [1], [0, 0, 1, 1], [], []>} : vector<16x32xf32>, vector<32x128xf32>, vector<16x128xf32> -> vector<16x128xf32>
    %19 = vector.broadcast %1 : vector<1x128xf32> to vector<16x128xf32>
    %20 = arith.addf %18, %19 : vector<16x128xf32>
    %21 = math.tanh %20 : vector<16x128xf32>
    %22 = vector.broadcast %2 : vector<1x128xf32> to vector<16x128xf32>
    %23 = arith.mulf %21, %22 : vector<16x128xf32>
    %cst_15 = arith.constant dense<0.000000e+00> : vector<128xf32>
    %24 = vector.multi_reduction <add>, %23, %cst_15 [0] : vector<16x128xf32> to vector<128xf32>
    %25 = vector.shape_cast %24 : vector<128xf32> to vector<1x128xf32>
    %c0_16 = arith.constant 0 : index
    %c1_17 = arith.constant 1 : index
    %c0_18 = arith.constant 0 : index
    %26 = vector.load %arg5[%c0_16, %c1_17, %c0_18] : memref<1x4x128xf32, #tpu.memory_space<vmem>>, vector<1x1x128xf32>
    %27 = vector.shape_cast %26 : vector<1x1x128xf32> to vector<1x128xf32>
    %28 = vector.shape_cast %25 : vector<1x128xf32> to vector<1x1x128xf32>
    tpu.vector_store %arg5[%c0_16, %c1_17, %c0_18], %28 {strides = array<i32>} : memref<1x4x128xf32, #tpu.memory_space<vmem>>, vector<1x1x128xf32>,
    %c2 = arith.constant 2 : index
    %c0_19 = arith.constant 0 : index
    %c0_20 = arith.constant 0 : index
    %29 = vector.load %arg1[%c2, %c0_19, %c0_20] : memref<4x16x32xf32, #tpu.memory_space<vmem>>, vector<1x16x32xf32>
    %30 = vector.shape_cast %29 : vector<1x16x32xf32> to vector<16x32xf32>
    %cst_21 = arith.constant dense<0.000000e+00> : vector<16x128xf32>
    %31 = tpu.matmul %30, %0, %cst_21 {dimension_numbers = #tpu.dot_dimension_numbers<[1], [0], [0], [1], [0, 0, 1, 1], [], []>} : vector<16x32xf32>, vector<32x128xf32>, vector<16x128xf32> -> vector<16x128xf32>
    %32 = vector.broadcast %1 : vector<1x128xf32> to vector<16x128xf32>
    %33 = arith.addf %31, %32 : vector<16x128xf32>
    %34 = math.tanh %33 : vector<16x128xf32>
    %35 = vector.broadcast %2 : vector<1x128xf32> to vector<16x128xf32>
    %36 = arith.mulf %34, %35 : vector<16x128xf32>
    %cst_22 = arith.constant dense<0.000000e+00> : vector<128xf32>
    %37 = vector.multi_reduction <add>, %36, %cst_22 [0] : vector<16x128xf32> to vector<128xf32>
    %38 = vector.shape_cast %37 : vector<128xf32> to vector<1x128xf32>
    %c0_23 = arith.constant 0 : index
    %c2_24 = arith.constant 2 : index
    %c0_25 = arith.constant 0 : index
    %39 = vector.load %arg5[%c0_23, %c2_24, %c0_25] : memref<1x4x128xf32, #tpu.memory_space<vmem>>, vector<1x1x128xf32>
    %40 = vector.shape_cast %39 : vector<1x1x128xf32> to vector<1x128xf32>
    %41 = vector.shape_cast %38 : vector<1x128xf32> to vector<1x1x128xf32>
    tpu.vector_store %arg5[%c0_23, %c2_24, %c0_25], %41 {strides = array<i32>} : memref<1x4x128xf32, #tpu.memory_space<vmem>>, vector<1x1x128xf32>,
    %c3 = arith.constant 3 : index
    %c0_26 = arith.constant 0 : index
    %c0_27 = arith.constant 0 : index
    %42 = vector.load %arg1[%c3, %c0_26, %c0_27] : memref<4x16x32xf32, #tpu.memory_space<vmem>>, vector<1x16x32xf32>
    %43 = vector.shape_cast %42 : vector<1x16x32xf32> to vector<16x32xf32>
    %cst_28 = arith.constant dense<0.000000e+00> : vector<16x128xf32>
    %44 = tpu.matmul %43, %0, %cst_28 {dimension_numbers = #tpu.dot_dimension_numbers<[1], [0], [0], [1], [0, 0, 1, 1], [], []>} : vector<16x32xf32>, vector<32x128xf32>, vector<16x128xf32> -> vector<16x128xf32>
    %45 = vector.broadcast %1 : vector<1x128xf32> to vector<16x128xf32>
    %46 = arith.addf %44, %45 : vector<16x128xf32>
    %47 = math.tanh %46 : vector<16x128xf32>
    %48 = vector.broadcast %2 : vector<1x128xf32> to vector<16x128xf32>
    %49 = arith.mulf %47, %48 : vector<16x128xf32>
    %cst_29 = arith.constant dense<0.000000e+00> : vector<128xf32>
    %50 = vector.multi_reduction <add>, %49, %cst_29 [0] : vector<16x128xf32> to vector<128xf32>
    %51 = vector.shape_cast %50 : vector<128xf32> to vector<1x128xf32>
    %c0_30 = arith.constant 0 : index
    %c3_31 = arith.constant 3 : index
    %c0_32 = arith.constant 0 : index
    %52 = vector.load %arg5[%c0_30, %c3_31, %c0_32] : memref<1x4x128xf32, #tpu.memory_space<vmem>>, vector<1x1x128xf32>
    %53 = vector.shape_cast %52 : vector<1x1x128xf32> to vector<1x128xf32>
    %54 = vector.shape_cast %51 : vector<1x128xf32> to vector<1x1x128xf32>
    tpu.vector_store %arg5[%c0_30, %c3_31, %c0_32], %54 {strides = array<i32>} : memref<1x4x128xf32, #tpu.memory_space<vmem>>, vector<1x1x128xf32>,
    return
  }
  func.func @transform_0(%arg0: i32) -> (i32, i32, i32) {
    %c0_i32 = arith.constant 0 : i32
    %c0_i32_0 = arith.constant 0 : i32
    %c0_i32_1 = arith.constant 0 : i32
    return %c0_i32, %arg0, %c0_i32_0 : i32, i32, i32
  }
  func.func @transform_1(%arg0: i32) -> (i32, i32) {
    %c0_i32 = arith.constant 0 : i32
    %c0_i32_0 = arith.constant 0 : i32
    %c0_i32_1 = arith.constant 0 : i32
    return %c0_i32, %c0_i32_0 : i32, i32
  }
  func.func @transform_2(%arg0: i32) -> (i32, i32) {
    %c0_i32 = arith.constant 0 : i32
    %c0_i32_0 = arith.constant 0 : i32
    %c0_i32_1 = arith.constant 0 : i32
    return %c0_i32, %c0_i32_0 : i32, i32
  }
  func.func @transform_3(%arg0: i32) -> (i32, i32) {
    %c0_i32 = arith.constant 0 : i32
    %c0_i32_0 = arith.constant 0 : i32
    %c0_i32_1 = arith.constant 0 : i32
    return %c0_i32, %c0_i32_0 : i32, i32
  }
  func.func @transform_4(%arg0: i32) -> (i32, i32, i32) {
    %c0_i32 = arith.constant 0 : i32
    %c0_i32_0 = arith.constant 0 : i32
    %c0_i32_1 = arith.constant 0 : i32
    return %arg0, %c0_i32, %c0_i32_0 : i32, i32, i32
  }
}

</mosaic_0001>

<bundles_post_ra>
// kernel: tpu_custom_call.1
= control target key start
LH: loop header
LB: loop body
LE: loop exit
PB: predicated region body
PF: predicated region fallthrough
CT: control target
= control target key end

     0   :  { %9 = vsyncpa [#allocation3], 0  ;;  %s418_s0 = inlined_call_operand.hbm [shape: f32[4,16,32], index: 0, kind: input, shape index: {}]   ;;  %s419_s1 = inlined_call_operand.hbm [shape: f32[32,128], index: 1, kind: input, shape index: {}]   ;;  %s420_s2 = inlined_call_operand.vmem [shape: f32[1,128], index: 2, kind: input, shape index: {}]   ;;  %s421_s3 = inlined_call_operand.vmem [shape: f32[1,128], index: 3, kind: input, shape index: {}]   ;;  %s422_s4 = inlined_call_operand.hbm [shape: f32[1,4,128], index: 4, kind: output, shape index: {}]  }
   0x1   :  { %10 = vsyncpa [#allocation6], 0 }
   0x2   :  { %11 = vsyncpa [#allocation4], 0  ;;  %s16_s17 = sshll.u32 %s418_s0, 4  ;;  %s365_s18 = smov [#allocation2]   ;;  %s17_s17 = int_to_ptr.hbm [resolvable:$true] %s16_s17 }
   0x3   :  { %s18_s19 = sshll.u32 %s365_s18, 4  ;;  %s29_s22 = sshll.u32 %s419_s1, 4  ;;  %s19_s19 = int_to_ptr.vmem [resolvable:$true] %s18_s19  ;;  %s30_s22 = int_to_ptr.hbm [resolvable:$true] %s29_s22 }
   0x4   :  { %s366_s23 = smov 128   ;;  %s367_s24 = smov 8  }
   0x5   :  { %24 = dma.hbm_to_vmem [thread:$0]  %s17_s17, 1024, %s19_s19, [#allocation3], %s366_s23, %s366_s23, %s367_s24  }
   0x6   :  { %s368_s25 = smov [#allocation5]  }
   0x7   :  { %s31_s26 = sshll.u32 %s368_s25, 4  ;;  %s32_s26 = int_to_ptr.vmem [resolvable:$true] %s31_s26 }
   0x8   :  { %37 = dma.hbm_to_vmem [thread:$0]  %s30_s22, 512, %s32_s26, [#allocation6], %s366_s23, %s366_s23, %s367_s24  }
   0x9   :  { %359 = dma.done.wait [#allocation3], 1024  }
   0xa   :  { %360 = vsyncadd [#allocation3], 4294966272 }
   0xb   :  { %361 = dma.done.wait [#allocation6], 512  }
   0xc   :  { %362 = vsyncadd [#allocation6], 4294966784  ;;  %v53_v0 = vld [vmem:[#allocation5 + $0x18] sm:$0xff]  ;;  %v52_v1 = vld [vmem:[#allocation5 + $0x10] sm:$0xff]  ;;  %vm61_vm0 = vcmask 261120   ;;  %s245_s5 = sshll.u32 %s422_s4, 4  ;;  %s246_s5 = int_to_ptr.hbm [resolvable:$true] %s245_s5 }
   0xd   :  { %80 = vmatpush.msra.mxu0 %v53_v0  ;;  %127 = vmatpush.msra.mxu1 %v53_v0  ;;  %v51_v2 = vld [vmem:[#allocation5 + $0x8] sm:$0xff]  ;;  %v50_v3 = vld [vmem:[#allocation5] sm:$0xff]  ;;  %v107_v5 = vld [vmem:[#allocation2 + $0x10] sm:$0xff] }
   0xe   :  { %171 = vmatpush.msra.mxu2 %v53_v0  ;;  %215 = vmatpush.msra.mxu3 %v53_v0  ;;  %v56_v4 = vld [vmem:[#allocation2] sm:$0xff]  ;;  %v195_v7 = vld [vmem:[#allocation2 + $0x30] sm:$0xff]  ;;  %v57_v8 = vld [vmem:[#allocation2 + $0x8] sm:$0xff] }
   0xf   :  { %81 = vmatpush.msra.mxu0 %v52_v1  ;;  %128 = vmatpush.msra.mxu1 %v52_v1  ;;  %v151_v6 = vld [vmem:[#allocation2 + $0x20] sm:$0xff]  ;;  %v108_v9 = vld [vmem:[#allocation2 + $0x18] sm:$0xff]  ;;  %v152_v10 = vld [vmem:[#allocation2 + $0x28] sm:$0xff] }
  0x10   :  { %172 = vmatpush.msra.mxu2 %v52_v1  ;;  %216 = vmatpush.msra.mxu3 %v52_v1  ;;  %v196_v11 = vld [vmem:[#allocation2 + $0x38] sm:$0xff]  ;;  %v269_v14 = vld [vmem:[%s420_s2] ss:$0 sm:$0xff]  ;;  %s369_s2 = smov [#allocation7]  }
  0x11   :  { %82 = vmatpush.msra.mxu0 %v51_v2  ;;  %129 = vmatpush.msra.mxu1 %v51_v2  ;;  %v270_v25 = vld [vmem:[%s421_s3] ss:$0 sm:$0xff]  ;;  %s243_s3 = sshll.u32 %s369_s2, 4  ;;  %s244_s3 = int_to_ptr.vmem [resolvable:$true] %s243_s3 }
  0x12   :  { %173 = vmatpush.msra.mxu2 %v51_v2  ;;  %217 = vmatpush.msra.mxu3 %v51_v2 }
  0x13   :  { %83 = vmatpush.msra.mxu0 %v50_v3  ;;  %130 = vmatpush.msra.mxu1 %v50_v3 }
  0x14   :  { %174 = vmatpush.msra.mxu2 %v50_v3  ;;  %218 = vmatpush.msra.mxu3 %v50_v3 }
  0x15   :  { %256 = vmatmul.msk.f32.vlgmr.msra.gmra.mxu0 %vm61_vm0, %v56_v4  ;;  %258 = vmatmul.msk.f32.vlgmr.msra.gmra.mxu1 %vm61_vm0, %v107_v5 }
  0x16   :  { %260 = vmatmul.msk.f32.vlgmr.msra.gmra.mxu2 %vm61_vm0, %v151_v6  ;;  %262 = vmatmul.msk.f32.vlgmr.msra.gmra.mxu3 %vm61_vm0, %v195_v7 }
  0x1d   :  { %257 = vmatmul.msk.f32.gmra.mxu0 %vm61_vm0, %v57_v8  ;;  %259 = vmatmul.msk.f32.gmra.mxu1 %vm61_vm0, %v108_v9 }
  0x1e   :  { %261 = vmatmul.msk.f32.gmra.mxu2 %vm61_vm0, %v152_v10  ;;  %263 = vmatmul.msk.f32.gmra.mxu3 %vm61_vm0, %v196_v11 }
  0x92   :  { %v85_v12 = vpop.f32.mrf.mxu0  ;;  %v132_v13 = vpop.f32.mrf.mxu1 }
  0x93   :  { %v86_v15 = vadd.f32 %v269_v14, %v85_v12  ;;  %v133_v16 = vadd.f32 %v269_v14, %v132_v13 }
  0x95   :  { %271 = vtanh.f32 %v86_v15 }
  0x96   :  { %273 = vtanh.f32 %v133_v16 }
  0x99   :  { %v176_v17 = vpop.f32.mrf.mxu2  ;;  %v220_v18 = vpop.f32.mrf.mxu3 }
  0x9a   :  { %v88_v19 = vpop.f32.mrf.mxu0  ;;  %v135_v20 = vpop.f32.mrf.mxu1  ;;  %v177_v23 = vadd.f32 %v269_v14, %v176_v17  ;;  %v221_v24 = vadd.f32 %v269_v14, %v220_v18 }
  0x9b   :  { %v89_v21 = vadd.f32 %v269_v14, %v88_v19  ;;  %v136_v22 = vadd.f32 %v269_v14, %v135_v20  ;;  %v272_v28 = vpop.eup %271 }
  0x9c   :  { %v274_v31 = vpop.eup %273  ;;  %v96_v34 = vmul.f32 %v272_v28, %v270_v25 }
  0x9d   :  { %275 = vtanh.f32 %v89_v21  ;;  %v140_v36 = vmul.f32 %v274_v31, %v270_v25 }
  0x9e   :  { %277 = vtanh.f32 %v136_v22 }
  0x9f   :  { %279 = vtanh.f32 %v177_v23 }
  0xa0   :  { %281 = vtanh.f32 %v221_v24 }
  0xa1   :  { %v179_v26 = vpop.f32.mrf.mxu2  ;;  %v223_v27 = vpop.f32.mrf.mxu3 }
  0xa2   :  { %v180_v29 = vadd.f32 %v269_v14, %v179_v26  ;;  %v224_v30 = vadd.f32 %v269_v14, %v223_v27 }
  0xa3   :  { %v276_v32 = vpop.eup %275 }
  0xa4   :  { %283 = vtanh.f32 %v180_v29  ;;  %v278_v33 = vpop.eup %277  ;;  %v97_v35 = vmul.f32 %v276_v32, %v270_v25 }
  0xa5   :  { %285 = vtanh.f32 %v224_v30  ;;  %v141_v37 = vmul.f32 %v278_v33, %v270_v25  ;;  %v280_v39 = vpop.eup %279 }
  0xa6   :  { %v98_v38 = vadd.f32 %v97_v35, %v96_v34  ;;  %v282_v41 = vpop.eup %281  ;;  %v184_v46 = vmul.f32 %v280_v39, %v270_v25 }
  0xa7   :  { %v142_v40 = vadd.f32 %v141_v37, %v140_v36  ;;  %v228_v49 = vmul.f32 %v282_v41, %v270_v25 }
  0xa8   :  { %v99_v42 = vrot.slane %v98_v38, 4 }
  0xa9   :  { %v143_v44 = vrot.slane %v142_v40, 4 }
  0xaa   :  { %v284_v43 = vpop.eup %283  ;;  %v100_v47 = vadd.f32 %v99_v42, %v98_v38 }
  0xab   :  { %v286_v45 = vpop.eup %285  ;;  %v185_v48 = vmul.f32 %v284_v43, %v270_v25  ;;  %v144_v50 = vadd.f32 %v143_v44, %v142_v40 }
  0xac   :  { %v229_v51 = vmul.f32 %v286_v45, %v270_v25  ;;  %v101_v52 = vrot.slane %v100_v47, 2 }
  0xad   :  { %v186_v53 = vadd.f32 %v185_v48, %v184_v46  ;;  %v145_v54 = vrot.slane %v144_v50, 2 }
  0xae   :  { %v230_v55 = vadd.f32 %v229_v51, %v228_v49  ;;  %v102_v56 = vadd.f32 %v101_v52, %v100_v47 }
  0xaf   :  { %v187_v57 = vrot.slane %v186_v53, 4  ;;  %v146_v58 = vadd.f32 %v145_v54, %v144_v50 }
  0xb0   :  { %v231_v59 = vrot.slane %v230_v55, 4  ;;  %v103_v61 = vrot.slane %v102_v56, 1 }
  0xb1   :  { %v188_v60 = vadd.f32 %v187_v57, %v186_v53  ;;  %v147_v63 = vrot.slane %v146_v58, 1 }
  0xb2   :  { %v232_v62 = vadd.f32 %v231_v59, %v230_v55  ;;  %v104_v1 = vadd.f32 %v103_v61, %v102_v56 }
  0xb3   :  { %v189_v0 = vrot.slane %v188_v60, 2  ;;  %v148_v3 = vadd.f32 %v147_v63, %v146_v58 }
  0xb4   :  { %v233_v2 = vrot.slane %v232_v62, 2  ;;  %105 = vst [vmem:[#allocation7] sm:$0x1] %v104_v1 }
  0xb5   :  { %v190_v4 = vadd.f32 %v189_v0, %v188_v60  ;;  %149 = vst [vmem:[#allocation7 + $0x1] sm:$0x1] %v148_v3 }
  0xb6   :  { %v234_v5 = vadd.f32 %v233_v2, %v232_v62 }
  0xb7   :  { %v191_v6 = vrot.slane %v190_v4, 1 }
  0xb8   :  { %v235_v7 = vrot.slane %v234_v5, 1 }
  0xb9   :  { %v192_v8 = vadd.f32 %v191_v6, %v190_v4 }
  0xba   :  { %v236_v9 = vadd.f32 %v235_v7, %v234_v5 }
  0xbb   :  { %193 = vst [vmem:[#allocation7 + $0x2] sm:$0x1] %v192_v8 }
  0xbc   :  { %237 = vst [vmem:[#allocation7 + $0x3] sm:$0x1] %v236_v9 }
  0xbd   :  { %248 = dma.vmem_to_hbm [thread:$0]  %s244_s3, 64, %s246_s5, [#allocation4]  }
  0xbe   :  { %363 = dma.done.wait [#allocation4], 64  }
  0xbf   :  { %364 = vsyncadd [#allocation4], 4294967232 }
  0xc0   :  { %253 = vsyncpa [#allocation3], 1 }
  0xc1   :  { %254 = vsyncpa [#allocation6], 1 }
  0xc2   :  { %255 = vsyncpa [#allocation4], 1 }

</bundles_post_ra>
